<compile_context>
chip_gen: v7x
topology: tpu7x:2x2x1
jax: 0.10.0
libtpu: 0.0.40
codegen_flags: <defaults>
</compile_context>

<pallas_src>
import jax
import jax.numpy as jnp
from jax.experimental import pallas as pl
from jax.experimental.pallas import tpu as pltpu


def mlp_kernel(x_ref, w1_ref, b1_ref, w2_ref, b2_ref, w3_ref, b3_ref, o_ref):
    mm_dtype = w1_ref.dtype  # bf16 (or f32) matmul operands; accumulation is f32
    # hidden1 = relu(x @ W1 + b1)
    h1 = jnp.dot(x_ref[...], w1_ref[...], preferred_element_type=jnp.float32)
    h1 = jnp.maximum(h1 + b1_ref[...], 0.0)
    # hidden2 = relu(h1 @ W2 + b2)
    h2 = jnp.dot(h1.astype(mm_dtype), w2_ref[...], preferred_element_type=jnp.float32)
    h2 = jnp.maximum(h2 + b2_ref[...], 0.0)
    # output = h2 @ W3 + b3  (no activation)
    out = jnp.dot(h2.astype(mm_dtype), w3_ref[...], preferred_element_type=jnp.float32)
    o_ref[...] = (out + b3_ref[...]).astype(o_ref.dtype)


def _cdiv(a, b):
    return -(-a // b)


def _round_up(n, m):
    return _cdiv(n, m) * m


def _pad_feature_dim(d):
    # Lane-dense 128-padding only pays when the dim actually fills 128-lane vregs;
    # for tiny dims a full-array block moves far fewer HBM bytes.
    return _round_up(d, 128) if d >= 128 else d


def _pad2d(a, rows, cols):
    return jnp.pad(a, ((0, rows - a.shape[0]), (0, cols - a.shape[1])))


def _batch_tiling(batch, batch_tile, sublane):
    """Size the batch tile to the batch (minimal padding waste); prefer >=2 tiles
    when the batch supports it so v7x's second TensorCore gets work."""
    n = max(1, _cdiv(batch, batch_tile))
    if n == 1 and batch >= 2 * sublane:
        n = 2
    tb = _round_up(_cdiv(batch, n), sublane)
    n_tiles = _cdiv(batch, tb)
    return tb, n_tiles * tb, n_tiles


def make_neural_net_forward(w1, b1, w2, b2, w3, b3, *, batch_tile=512, use_bf16=True):
    """Build a jitted forward(x) for the 3-layer MLP.

    w_k: (in_k, out_k) (transposed vs torch's (out, in)); b_k: (out_k,) or (1, out_k).
    Returns a float32 output of shape (batch, num_output).
    """
    num_input, num_hidden = w1.shape
    num_output = w3.shape[1]
    d_in = _pad_feature_dim(num_input)
    d_hid = _pad_feature_dim(num_hidden)
    d_out = _pad_feature_dim(num_output)

    mm_dtype = jnp.bfloat16 if use_bf16 else jnp.float32
    sublane = 16 if use_bf16 else 8
    bpe = 2 if use_bf16 else 4

    # ---- constant params: pad + cast ONCE (hoisted out of the per-call path) ----
    # Zero-padding is exact through the matmul/ReLU chain; biases stay f32 (added to
    # the f32 accumulator inside the kernel).
    w1p = _pad2d(jnp.asarray(w1, jnp.float32), d_in, d_hid).astype(mm_dtype)
    w2p = _pad2d(jnp.asarray(w2, jnp.float32), d_hid, d_hid).astype(mm_dtype)
    w3p = _pad2d(jnp.asarray(w3, jnp.float32), d_hid, d_out).astype(mm_dtype)
    b1p = _pad2d(jnp.asarray(b1, jnp.float32).reshape(1, -1), 1, d_hid)
    b2p = _pad2d(jnp.asarray(b2, jnp.float32).reshape(1, -1), 1, d_hid)
    b3p = _pad2d(jnp.asarray(b3, jnp.float32).reshape(1, -1), 1, d_out)

    weight_bytes = bpe * (d_in * d_hid + d_hid * d_hid + d_hid * d_out)
    bias_bytes = 4 * (2 * d_hid + d_out)
    # TODO(synk): if d_hid grows so large that resident weights overflow v7x's 64 MiB
    # VMEM (~2-3K hidden in bf16), add a K-tiled grid axis ("arbitrary") + f32 acc scratch.

    # Weights / biases: same (0, 0) block every grid step -> DMA'd once, VMEM-resident.
    resident = lambda shape: pl.BlockSpec(shape, lambda i: (0, 0))

    @jax.jit
    def forward(x):
        batch = x.shape[0]
        tb, b_pad, n_tiles = _batch_tiling(batch, batch_tile, sublane)

        xp = _pad2d(jnp.asarray(x, jnp.float32), b_pad, d_in).astype(mm_dtype)

        # VMEM budget: default pipeline double-buffers every block (x2) + f32 h1/h2.
        need = (2 * (weight_bytes + bias_bytes)
                + 2 * (bpe * tb * d_in + 4 * tb * d_out)
                + 2 * 4 * tb * d_hid)
        vmem_limit = int(min(max(2 * need, 32 << 20), 64 << 20))

        flops = 2 * b_pad * (d_in * d_hid + d_hid * d_hid + d_hid * d_out)
        bytes_accessed = (bpe * b_pad * d_in + weight_bytes + bias_bytes
                          + 4 * b_pad * d_out)

        out_padded = pl.pallas_call(
            mlp_kernel,
            out_shape=jax.ShapeDtypeStruct((b_pad, d_out), jnp.float32),
            grid=(n_tiles,),
            in_specs=[
                pl.BlockSpec((tb, d_in), lambda i: (i, 0)),  # x: tiled over batch
                resident((d_in, d_hid)),    # W1 (bf16)
                resident((1, d_hid)),       # b1 (f32)
                resident((d_hid, d_hid)),   # W2 (bf16)
                resident((1, d_hid)),       # b2 (f32)
                resident((d_hid, d_out)),   # W3 (bf16)
                resident((1, d_out)),       # b3 (f32)
            ],
            out_specs=pl.BlockSpec((tb, d_out), lambda i: (i, 0)),
            compiler_params=pltpu.CompilerParams(
                # "parallel" only buys anything with >1 tile (v7x megacore sharding).
                dimension_semantics=("parallel",) if n_tiles > 1 else ("arbitrary",),
                vmem_limit_bytes=vmem_limit,
            ),
            cost_estimate=pl.CostEstimate(
                flops=int(flops),
                transcendentals=0,
                bytes_accessed=int(bytes_accessed),
            ),
        )(xp, w1p, b1p, w2p, b2p, w3p, b3p)

        return out_padded[:batch, :num_output]

    return forward


def init_params(key, num_input, num_hidden, num_output):
    """Deterministic init mimicking nn.Linear (uniform +/- 1/sqrt(fan_in))."""
    ks = jax.random.split(key, 6)

    def lin(kw, kb, fan_in, fan_out):
        bound = 1.0 / jnp.sqrt(fan_in)
        # stored as (in, out) so kernel does x @ W
        w = jax.random.uniform(kw, (fan_in, fan_out), jnp.float32, -bound, bound)
        b = jax.random.uniform(kb, (1, fan_out), jnp.float32, -bound, bound)
        return w, b

    w1, b1 = lin(ks[0], ks[1], num_input, num_hidden)
    w2, b2 = lin(ks[2], ks[3], num_hidden, num_hidden)
    w3, b3 = lin(ks[4], ks[5], num_hidden, num_output)
    return w1, b1, w2, b2, w3, b3


if __name__ == "__main__":
    num_input, num_hidden, num_output = 16, 32, 4
    batch = 8

    key = jax.random.PRNGKey(0)
    kx, kp = jax.random.split(key)
    x = jax.random.normal(kx, (batch, num_input), jnp.float32)
    w1, b1, w2, b2, w3, b3 = init_params(kp, num_input, num_hidden, num_output)

    forward = make_neural_net_forward(w1, b1, w2, b2, w3, b3)
    out = jax.block_until_ready(forward(x))
    assert out.shape == (batch, num_output)

    # Reference 1 (tight): emulate the kernel's bf16-operand / f32-accumulate numerics.
    def bf(v):
        return v.astype(jnp.bfloat16).astype(jnp.float32)

    r = jnp.maximum(bf(x) @ bf(w1) + b1, 0.0)
    r = jnp.maximum(bf(r) @ bf(w2) + b2, 0.0)
    ref_bf16 = bf(r) @ bf(w3) + b3
    assert jnp.allclose(out, ref_bf16, atol=2e-3, rtol=2e-3)

    # Reference 2 (loose): true f32 forward; bounds the bf16 quantization error.
    r32 = jnp.maximum(x @ w1 + b1, 0.0)
    r32 = jnp.maximum(r32 @ w2 + b2, 0.0)
    ref_f32 = r32 @ w3 + b3
    assert jnp.allclose(out, ref_f32, atol=5e-2, rtol=5e-2)

    print("KERNEL_OK")
</pallas_src>

<mosaic_0001>
module attributes {stable_mosaic.version = 11 : i64} {
  func.func @mlp_kernel(%arg0: i32, %arg1: memref<16x16xbf16, #tpu.memory_space<vmem>>, %arg2: memref<16x32xbf16, #tpu.memory_space<vmem>>, %arg3: memref<1x32xf32, #tpu.memory_space<vmem>>, %arg4: memref<32x32xbf16, #tpu.memory_space<vmem>>, %arg5: memref<1x32xf32, #tpu.memory_space<vmem>>, %arg6: memref<32x4xbf16, #tpu.memory_space<vmem>>, %arg7: memref<1x4xf32, #tpu.memory_space<vmem>>, %arg8: memref<16x4xf32, #tpu.memory_space<vmem>>) attributes {dimension_semantics = [#tpu.dimension_semantics<arbitrary>], iteration_bounds = array<i64: 1>, scalar_prefetch = 0 : i64, scratch_operands = 0 : i64, tpu.core_type = #tpu.core_type<tc>, window_params = [{transform_indices = @transform_0, window_bounds = array<i64: 16, 16>}, {pipeline_mode = #tpu.pipeline_mode<synchronous>, transform_indices = @transform_1, window_bounds = array<i64: 16, 32>}, {pipeline_mode = #tpu.pipeline_mode<synchronous>, transform_indices = @transform_2, window_bounds = array<i64: 1, 32>}, {pipeline_mode = #tpu.pipeline_mode<synchronous>, transform_indices = @transform_3, window_bounds = array<i64: 32, 32>}, {pipeline_mode = #tpu.pipeline_mode<synchronous>, transform_indices = @transform_4, window_bounds = array<i64: 1, 32>}, {pipeline_mode = #tpu.pipeline_mode<synchronous>, transform_indices = @transform_5, window_bounds = array<i64: 32, 4>}, {pipeline_mode = #tpu.pipeline_mode<synchronous>, transform_indices = @transform_6, window_bounds = array<i64: 1, 4>}, {transform_indices = @transform_7, window_bounds = array<i64: 16, 4>}]} {
    %c0 = arith.constant 0 : index
    %c0_0 = arith.constant 0 : index
    %0 = vector.load %arg1[%c0, %c0_0] : memref<16x16xbf16, #tpu.memory_space<vmem>>, vector<16x16xbf16>
    %c0_1 = arith.constant 0 : index
    %c0_2 = arith.constant 0 : index
    %1 = vector.load %arg2[%c0_1, %c0_2] : memref<16x32xbf16, #tpu.memory_space<vmem>>, vector<16x32xbf16>
    %cst = arith.constant dense<0.000000e+00> : vector<16x32xf32>
    %2 = tpu.matmul %0, %1, %cst {dimension_numbers = #tpu.dot_dimension_numbers<[1], [0], [0], [1], [0, 0, 1, 1], [], []>} : vector<16x16xbf16>, vector<16x32xbf16>, vector<16x32xf32> -> vector<16x32xf32>
    %c0_3 = arith.constant 0 : index
    %c0_4 = arith.constant 0 : index
    %3 = vector.load %arg3[%c0_3, %c0_4] : memref<1x32xf32, #tpu.memory_space<vmem>>, vector<1x32xf32>
    %4 = vector.broadcast %3 : vector<1x32xf32> to vector<16x32xf32>
    %5 = arith.addf %2, %4 : vector<16x32xf32>
    %cst_5 = arith.constant 0.000000e+00 : f32
    %6 = vector.broadcast %cst_5 : f32 to vector<16x32xf32>
    %7 = arith.maximumf %5, %6 : vector<16x32xf32>
    %8 = arith.truncf %7 : vector<16x32xf32> to vector<16x32xbf16>
    %c0_6 = arith.constant 0 : index
    %c0_7 = arith.constant 0 : index
    %9 = vector.load %arg4[%c0_6, %c0_7] : memref<32x32xbf16, #tpu.memory_space<vmem>>, vector<32x32xbf16>
    %cst_8 = arith.constant dense<0.000000e+00> : vector<16x32xf32>
    %10 = tpu.matmul %8, %9, %cst_8 {dimension_numbers = #tpu.dot_dimension_numbers<[1], [0], [0], [1], [0, 0, 1, 1], [], []>} : vector<16x32xbf16>, vector<32x32xbf16>, vector<16x32xf32> -> vector<16x32xf32>
    %c0_9 = arith.constant 0 : index
    %c0_10 = arith.constant 0 : index
    %11 = vector.load %arg5[%c0_9, %c0_10] : memref<1x32xf32, #tpu.memory_space<vmem>>, vector<1x32xf32>
    %12 = vector.broadcast %11 : vector<1x32xf32> to vector<16x32xf32>
    %13 = arith.addf %10, %12 : vector<16x32xf32>
    %cst_11 = arith.constant 0.000000e+00 : f32
    %14 = vector.broadcast %cst_11 : f32 to vector<16x32xf32>
    %15 = arith.maximumf %13, %14 : vector<16x32xf32>
    %16 = arith.truncf %15 : vector<16x32xf32> to vector<16x32xbf16>
    %c0_12 = arith.constant 0 : index
    %c0_13 = arith.constant 0 : index
    %17 = vector.load %arg6[%c0_12, %c0_13] : memref<32x4xbf16, #tpu.memory_space<vmem>>, vector<32x4xbf16>
    %cst_14 = arith.constant dense<0.000000e+00> : vector<16x4xf32>
    %18 = tpu.matmul %16, %17, %cst_14 {dimension_numbers = #tpu.dot_dimension_numbers<[1], [0], [0], [1], [0, 0, 1, 1], [], []>} : vector<16x32xbf16>, vector<32x4xbf16>, vector<16x4xf32> -> vector<16x4xf32>
    %c0_15 = arith.constant 0 : index
    %c0_16 = arith.constant 0 : index
    %19 = vector.load %arg7[%c0_15, %c0_16] : memref<1x4xf32, #tpu.memory_space<vmem>>, vector<1x4xf32>
    %20 = vector.broadcast %19 : vector<1x4xf32> to vector<16x4xf32>
    %21 = arith.addf %18, %20 : vector<16x4xf32>
    %c0_17 = arith.constant 0 : index
    %c0_18 = arith.constant 0 : index
    %22 = vector.load %arg8[%c0_17, %c0_18] : memref<16x4xf32, #tpu.memory_space<vmem>>, vector<16x4xf32>
    tpu.vector_store %arg8[%c0_17, %c0_18], %21 {strides = array<i32>} : memref<16x4xf32, #tpu.memory_space<vmem>>, vector<16x4xf32>,
    return
  }
  func.func @transform_0(%arg0: i32) -> (i32, i32) {
    %c0_i32 = arith.constant 0 : i32
    %c0_i32_0 = arith.constant 0 : i32
    return %arg0, %c0_i32 : i32, i32
  }
  func.func @transform_1(%arg0: i32) -> (i32, i32) {
    %c0_i32 = arith.constant 0 : i32
    %c0_i32_0 = arith.constant 0 : i32
    %c0_i32_1 = arith.constant 0 : i32
    return %c0_i32, %c0_i32_0 : i32, i32
  }
  func.func @transform_2(%arg0: i32) -> (i32, i32) {
    %c0_i32 = arith.constant 0 : i32
    %c0_i32_0 = arith.constant 0 : i32
    %c0_i32_1 = arith.constant 0 : i32
    return %c0_i32, %c0_i32_0 : i32, i32
  }
  func.func @transform_3(%arg0: i32) -> (i32, i32) {
    %c0_i32 = arith.constant 0 : i32
    %c0_i32_0 = arith.constant 0 : i32
    %c0_i32_1 = arith.constant 0 : i32
    return %c0_i32, %c0_i32_0 : i32, i32
  }
  func.func @transform_4(%arg0: i32) -> (i32, i32) {
    %c0_i32 = arith.constant 0 : i32
    %c0_i32_0 = arith.constant 0 : i32
    %c0_i32_1 = arith.constant 0 : i32
    return %c0_i32, %c0_i32_0 : i32, i32
  }
  func.func @transform_5(%arg0: i32) -> (i32, i32) {
    %c0_i32 = arith.constant 0 : i32
    %c0_i32_0 = arith.constant 0 : i32
    %c0_i32_1 = arith.constant 0 : i32
    return %c0_i32, %c0_i32_0 : i32, i32
  }
  func.func @transform_6(%arg0: i32) -> (i32, i32) {
    %c0_i32 = arith.constant 0 : i32
    %c0_i32_0 = arith.constant 0 : i32
    %c0_i32_1 = arith.constant 0 : i32
    return %c0_i32, %c0_i32_0 : i32, i32
  }
  func.func @transform_7(%arg0: i32) -> (i32, i32) {
    %c0_i32 = arith.constant 0 : i32
    %c0_i32_0 = arith.constant 0 : i32
    return %arg0, %c0_i32 : i32, i32
  }
}

</mosaic_0001>

<bundles_post_ra>
// kernel: forward.1
= control target key start
LH: loop header
LB: loop body
LE: loop exit
PB: predicated region body
PF: predicated region fallthrough
CT: control target
= control target key end

     0   :  { %12 = vsyncpa [#allocation3], 0  ;;  %s330_s24 = smov [#allocation2]   ;;  %s417_s0 = inlined_call_operand.vmem [shape: bf16[16,16], index: 0, kind: input, shape index: {}]   ;;  %s418_s1 = inlined_call_operand.vmem [shape: bf16[16,32], index: 1, kind: input, shape index: {}]   ;;  %s419_s2 = inlined_call_operand.hbm [shape: f32[1,32], index: 2, kind: input, shape index: {}]   ;;  %s420_s3 = inlined_call_operand.vmem [shape: bf16[32,32], index: 3, kind: input, shape index: {}]   ;;  %s421_s4 = inlined_call_operand.vmem [shape: f32[1,32], index: 4, kind: input, shape index: {}]   ;;  %s422_s5 = inlined_call_operand.vmem [shape: bf16[32,4], index: 5, kind: input, shape index: {}]   ;;  %s423_s6 = inlined_call_operand.vmem [shape: f32[1,4], index: 6, kind: input, shape index: {}]   ;;  %s424_s7 = inlined_call_operand.vmem [shape: f32[16,4], index: 7, kind: output, shape index: {}]  }
   0x1   :  { %s23_s25 = sshll.u32 %s330_s24, 4  ;;  %s306_s28 = scalar_lea.hbm %s419_s2, 16  ;;  %s24_s25 = int_to_ptr.vmem [resolvable:$true] %s23_s25 }
   0x2   :  { %p307_p0 = scmp.ne.s32.totalorder %s419_s2, %s306_s28  ;;  %p310_p1 = scmp.lt.u32.totalorder %s306_s28, %s419_s2 }
   0x4   :  { %p312_p2 = pnand %p310_p1, %p307_p0 }
   0x6   :  { %315 = shalt.err (!%p312_p2)
}
   0x7   :  { %s316_s10 = scalar_lea.vmem %s24_s25, 16  ;;  %s320_s11 = scalar_lea.vmem %s24_s25, 32 }
   0x8   :  { %p317_p3 = scmp.ne.s32.totalorder %s24_s25, %s316_s10  ;;  %p321_p4 = scmp.lt.s32.totalorder %s24_s25, %s24_s25 }
   0x9   :  { %p322_p5 = scmp.lt.s32.totalorder %s320_s11, %s316_s10 }
   0xb   :  { %p323_p6 = por %p322_p5, %p321_p4 }
   0xd   :  { %p324_p7 = pnand %p323_p6, %p317_p3 }
   0xf   :  { %327 = shalt.err (!%p324_p7)
}
  0x10   :  { %26 = dma.hbm_to_vmem [thread:$0]  %s419_s2, 16, %s24_s25, [#allocation3]  }
  0x11   :  { %328 = dma.done.wait [#allocation3], 16  }
  0x12   :  { %329 = vsyncadd [#allocation3], 4294967280  ;;  %v331_v0 = vmov 0.0   ;;  %vm332_vm0 = vmmov 0   ;;  %v300_v1 = vld [vmem:[%s418_s1] sm:$0xff]   ;;  %vm61_vm1 = vcmask 130048  }
  0x13   :  { %275 = vmatprep.subr.bf16.mxu0 %v331_v0  ;;  %277 = vmatprep.mubr.msk.bf16.mxu0 %vm332_vm0, %v331_v0  ;;  %v301_v2 = vld [vmem:[%s417_s0] sm:$0xff]   ;;  %v303_v4 = vld [vmem:[%s420_s3 + $0x8] sm:$0xff]   ;;  %vm132_vm2 = vcmask 261120   ;;  %vm247_vm3 = vcmask 31744  }
  0x14   :  { %281 = vmatprep.subr.bf16.mxu1 %v331_v0  ;;  %285 = vmatprep.mubr.msk.bf16.mxu1 %vm332_vm0, %v331_v0  ;;  %v302_v3 = vld [vmem:[%s420_s3] sm:$0xff]   ;;  %v305_v16 = vld [vmem:[%s422_s5 + $0x8] sm:$0xff]  }
  0x15   :  { %276 = vmatpush3.bf16.msra.mxu0 %v300_v1  ;;  %282 = vmatpush3.bf16.msra.mxu1 %v302_v3  ;;  %v255_v5 = vld [vmem:[#allocation2] ss:$0 sm:$0xff] }
  0x16   :  { %289 = vmatprep.subr.bf16.mxu0 %v331_v0  ;;  %283 = vmatprep.subr.bf16.mxu1 %v331_v0  ;;  %v304_v15 = vld [vmem:[%s422_s5] sm:$0xff]  }
  0x17   :  { %v259_v17 = vld [vmem:[%s421_s4] ss:$0 sm:$0xff] }
  0x18   :  { %278 = vmatmul.mubr.msk.bf16.vlgmr.msra.gmra.mrb[0].mxu0 %vm61_vm1, %v301_v2  ;;  %v263_v27 = vld [vmem:[%s423_s6] ss:$0 sm:$0xff] }
  0x19   :  { %293 = vmatprep.mubr.msk.bf16.mxu0 %vm332_vm0, %v331_v0  ;;  %284 = vmatpush3.bf16.msra.mxu1 %v303_v4 }
  0x1a   :  { %290 = vmatpush3.bf16.msra.mxu0 %v304_v15 }
  0x1b   :  { %291 = vmatprep.subr.bf16.mxu0 %v331_v0 }
  0x1e   :  { %292 = vmatpush3.bf16.msra.mxu0 %v305_v16 }
  0xeb   :  { %v99_v6 = vpop.f32.mrb[0].mxu0 }
  0xec   :  { %v100_v7 = vadd.f32 %v255_v5, %v99_v6  ;;  %v279_v8 = vpop.f32.mrb[1].mxu0 }
  0xed   :  { %v102_v9 = vpop.f32.mrb[2].mxu0 }
  0xee   :  { %v103_v10 = vadd.f32 %v255_v5, %v102_v9  ;;  %v280_v11 = vpop.f32.mrb[3].mxu0  ;;  %v106_v12 = vmax.f32 %v100_v7, 0.0 }
  0xf0   :  { %v107_v13 = vmax.f32 %v103_v10, 0.0 }
  0xf2   :  { %v108_v14 = vpack.c.bf16 %v107_v13, %v106_v12 }
  0xf4   :  { %286 = vmatmul.mubr.msk.bf16.vlgmr.msra.gmra.mrb[0].mxu1 %vm132_vm2, %v108_v14 }
 0x1c7   :  { %v170_v18 = vpop.f32.mrb[0].mxu1 }
 0x1c8   :  { %v171_v19 = vadd.f32 %v259_v17, %v170_v18  ;;  %v287_v20 = vpop.f32.mrb[1].mxu1 }
 0x1c9   :  { %v173_v21 = vpop.f32.mrb[2].mxu1 }
 0x1ca   :  { %v174_v22 = vadd.f32 %v259_v17, %v173_v21  ;;  %v288_v23 = vpop.f32.mrb[3].mxu1  ;;  %v177_v24 = vmax.f32 %v171_v19, 0.0 }
 0x1cc   :  { %v178_v25 = vmax.f32 %v174_v22, 0.0 }
 0x1ce   :  { %v179_v26 = vpack.c.bf16 %v178_v25, %v177_v24 }
 0x1d0   :  { %294 = vmatmul.mubr.msk.bf16.vlgmr.msra.gmra.mrb[4].mxu0 %vm132_vm2, %v179_v26 }
 0x2a3   :  { %v240_v28 = vpop.f32.mrb[4].mxu0 }
 0x2a4   :  { %v241_v29 = vadd.f32 %v263_v27, %v240_v28  ;;  %v295_v30 = vpop.f32.mrb[5].mxu0 }
 0x2a5   :  { %v243_v31 = vpop.f32.mrb[6].mxu0 }
 0x2a6   :  { %248 = vst.msk [vmem:[%s424_s7] sm:$0xff] %vm247_vm3, %v241_v29  ;;  %v244_v32 = vadd.f32 %v263_v27, %v243_v31  ;;  %v296_v33 = vpop.f32.mrb[7].mxu0 }
 0x2a8   :  { %249 = vst.msk [vmem:[%s424_s7 + $0x8] sm:$0xff] %vm247_vm3, %v244_v32 }
 0x2a9   :  { %254 = vsyncpa [#allocation3], 1 }

</bundles_post_ra>
